<compile_context>
chip_gen: v6e
topology: v6e:2x2x1
jax: 0.10.0
libtpu: 0.0.40
codegen_flags: <defaults>
</compile_context>

<pallas_src>
import jax
import jax.numpy as jnp
from jax.experimental import pallas as pl
from jax.experimental.pallas import tpu as pltpu


def _round_up(n, m):
    return ((n + m - 1) // m) * m


def anomaly_kernel(x_ref,
                   w1_ref, b1_ref,
                   w2_ref, b2_ref,
                   w3_ref, b3_ref,
                   w4_ref, b4_ref,
                   o_ref):
    # Activation tile (TM, W): cast to bf16 for the MXU, accumulate in f32.
    h = x_ref[...].astype(jnp.bfloat16)

    # layer1: Conv1d(W, W, k=1) == Linear(W -> W), + ReLU
    h = jnp.dot(h, w1_ref[...], preferred_element_type=jnp.float32) + b1_ref[...]
    h = jnp.maximum(h, 0.0).astype(jnp.bfloat16)                      # (TM, W)

    # layer2: Conv1d(W, 2W, k=1) == Linear(W -> 2W); flatten is a no-op, + ReLU
    h = jnp.dot(h, w2_ref[...], preferred_element_type=jnp.float32) + b2_ref[...]
    h = jnp.maximum(h, 0.0).astype(jnp.bfloat16)                      # (TM, 2W)

    # fc1: Linear(2W -> 4W) + ReLU
    h = jnp.dot(h, w3_ref[...], preferred_element_type=jnp.float32) + b3_ref[...]
    h = jnp.maximum(h, 0.0).astype(jnp.bfloat16)                      # (TM, 4W)

    # fc2: Linear(4W -> W) + sigmoid
    z = jnp.dot(h, w4_ref[...], preferred_element_type=jnp.float32) + b4_ref[...]
    # sigmoid = 1 / (1 + exp(-z)); exp and approx reciprocal both run on the
    # EUP slot (free w.r.t. VALU); exp(-z)=inf for very negative z still yields
    # the correct 0 after the reciprocal.
    o_ref[...] = pl.reciprocal(1.0 + jnp.exp(-z), approx=True)        # (TM, W)


def anomaly_forward(x, params, *, tm=None):
    """x: (B, W) float32.  params: bf16 (in, out) weights, f32 (1, out) biases."""
    B, W = x.shape
    w1, b1 = params["w1"], params["b1"]   # (W, W),   (1, W)
    w2, b2 = params["w2"], params["b2"]   # (W, 2W),  (1, 2W)
    w3, b3 = params["w3"], params["b3"]   # (2W, 4W), (1, 4W)
    w4, b4 = params["w4"], params["b4"]   # (4W, W),  (1, W)

    # Batch tile: >=256 rows fills a v6e/v7x MXU (128 is enough for v5e); for
    # tiny batches just round up to the sublane granule (8) -- the kernel is
    # HBM-bound on weight bytes anyway.
    if tm is None:
        tm = 256 if B >= 256 else _round_up(B, 8)
    tm = min(tm, _round_up(B, 8))
    b_pad = _round_up(B, tm)
    if b_pad != B:
        x = jnp.pad(x, ((0, b_pad - B), (0, 0)))
    grid = (b_pad // tm,)

    # x / out are tiled over the batch grid (auto double-buffered -> DMA
    # overlaps compute); weights use a constant index_map so the same block is
    # reused every grid step and stays resident in VMEM.
    act_spec = pl.BlockSpec((tm, W), lambda i: (i, 0))
    resident = lambda a: pl.BlockSpec(a.shape, lambda i: (0, 0))

    weight_arrays = (w1, b1, w2, b2, w3, b3, w4, b4)
    weight_bytes = sum(int(a.size) * a.dtype.itemsize for a in weight_arrays)
    act_bytes = 2 * 2 * tm * W * 4                      # x/out tiles, double-buffered
    scratch_bytes = tm * (W + 2 * W + 4 * W + W) * 4    # intermediate activations
    # Stay under v7x's 64 MiB physical VMEM (48 MiB leaves headroom); v5e/v6e
    # have 128 MiB so this cap is always safe.
    vmem_limit = int(min(2 * weight_bytes + act_bytes + scratch_bytes + (4 << 20),
                         48 << 20))
    # TODO(synk): at window=1024 on v7x, double-buffered bf16 weights (~60 MiB)
    # exceed this budget -- stream w3/w4 in K-chunks via pltpu.emit_pipeline.

    flops = 2 * b_pad * 15 * W * W          # W*W + W*2W + 2W*4W + 4W*W = 15*W^2
    bytes_accessed = weight_bytes + 2 * b_pad * W * 4   # weights + x + out

    out = pl.pallas_call(
        anomaly_kernel,
        out_shape=jax.ShapeDtypeStruct((b_pad, W), jnp.float32),
        grid_spec=pl.GridSpec(
            grid=grid,
            in_specs=[
                act_spec,
                resident(w1), resident(b1),
                resident(w2), resident(b2),
                resident(w3), resident(b3),
                resident(w4), resident(b4),
            ],
            out_specs=act_spec,
        ),
        compiler_params=pltpu.CompilerParams(
            dimension_semantics=("parallel",),
            vmem_limit_bytes=vmem_limit,
        ),
        cost_estimate=pl.CostEstimate(
            flops=flops,
            transcendentals=b_pad * W,
            bytes_accessed=bytes_accessed,
        ),
    )(x, w1, b1, w2, b2, w3, b3, w4, b4)

    return out[:B] if b_pad != B else out


def init_params(key, window):
    """Deterministic init mimicking PyTorch's default U(-1/sqrt(fan_in), +)."""
    W = window
    dims = [("1", W, W), ("2", W, 2 * W), ("3", 2 * W, 4 * W), ("4", 4 * W, W)]
    params = {}
    for name, fan_in, fan_out in dims:
        key, kw, kb = jax.random.split(key, 3)
        bound = 1.0 / jnp.sqrt(float(fan_in))
        # Stored as (in, out) == transposed PyTorch (out, in) weight.  bf16 to
        # halve HBM traffic; the kernel accumulates in f32.
        params["w" + name] = jax.random.uniform(
            kw, (fan_in, fan_out), jnp.float32, -bound, bound).astype(jnp.bfloat16)
        params["b" + name] = jax.random.uniform(
            kb, (1, fan_out), jnp.float32, -bound, bound)
    return params


def reference_forward(x, p):
    """Pure-JAX reference with the same bf16-weight / f32-accumulate numerics."""
    def lin(h, w, b):
        return jnp.dot(h.astype(jnp.bfloat16), w,
                       preferred_element_type=jnp.float32) + b
    h = jnp.maximum(lin(x, p["w1"], p["b1"]), 0.0)
    h = jnp.maximum(lin(h, p["w2"], p["b2"]), 0.0)
    h = jnp.maximum(lin(h, p["w3"], p["b3"]), 0.0)
    z = lin(h, p["w4"], p["b4"])
    return jax.nn.sigmoid(z)


if __name__ == "__main__":
    WINDOW = 128   # small, lane-aligned stand-in for the default window=1024
    BATCH = 32
    TM = 8         # small batch tile -> 4 grid steps, exercises the pipeline

    key = jax.random.PRNGKey(0)
    key, kx = jax.random.split(key)
    x = jax.random.normal(kx, (BATCH, WINDOW), dtype=jnp.float32)

    params = init_params(key, WINDOW)

    out = anomaly_forward(x, params, tm=TM)
    out = jax.block_until_ready(out)

    ref = reference_forward(x, params)
    assert out.shape == (BATCH, WINDOW)
    err = float(jnp.max(jnp.abs(out - ref)))
    assert err < 1e-2, f"max abs err {err}"

    print("KERNEL_OK")
</pallas_src>

<mosaic_0001>
module attributes {stable_mosaic.version = 11 : i64} {
  func.func @anomaly_kernel(%arg0: i32, %arg1: memref<8x128xf32, #tpu.memory_space<vmem>>, %arg2: memref<128x128xbf16, #tpu.memory_space<vmem>>, %arg3: memref<1x128xf32, #tpu.memory_space<vmem>>, %arg4: memref<128x256xbf16, #tpu.memory_space<vmem>>, %arg5: memref<1x256xf32, #tpu.memory_space<vmem>>, %arg6: memref<256x512xbf16, #tpu.memory_space<vmem>>, %arg7: memref<1x512xf32, #tpu.memory_space<vmem>>, %arg8: memref<512x128xbf16, #tpu.memory_space<vmem>>, %arg9: memref<1x128xf32, #tpu.memory_space<vmem>>, %arg10: memref<8x128xf32, #tpu.memory_space<vmem>>) attributes {dimension_semantics = [#tpu.dimension_semantics<parallel>], iteration_bounds = array<i64: 4>, scalar_prefetch = 0 : i64, scratch_operands = 0 : i64, tpu.core_type = #tpu.core_type<tc>, window_params = [{transform_indices = @transform_0, window_bounds = array<i64: 8, 128>}, {pipeline_mode = #tpu.pipeline_mode<synchronous>, transform_indices = @transform_1, window_bounds = array<i64: 128, 128>}, {pipeline_mode = #tpu.pipeline_mode<synchronous>, transform_indices = @transform_2, window_bounds = array<i64: 1, 128>}, {pipeline_mode = #tpu.pipeline_mode<synchronous>, transform_indices = @transform_3, window_bounds = array<i64: 128, 256>}, {pipeline_mode = #tpu.pipeline_mode<synchronous>, transform_indices = @transform_4, window_bounds = array<i64: 1, 256>}, {pipeline_mode = #tpu.pipeline_mode<synchronous>, transform_indices = @transform_5, window_bounds = array<i64: 256, 512>}, {pipeline_mode = #tpu.pipeline_mode<synchronous>, transform_indices = @transform_6, window_bounds = array<i64: 1, 512>}, {pipeline_mode = #tpu.pipeline_mode<synchronous>, transform_indices = @transform_7, window_bounds = array<i64: 512, 128>}, {pipeline_mode = #tpu.pipeline_mode<synchronous>, transform_indices = @transform_8, window_bounds = array<i64: 1, 128>}, {transform_indices = @transform_9, window_bounds = array<i64: 8, 128>}]} {
    %c0 = arith.constant 0 : index
    %c0_0 = arith.constant 0 : index
    %0 = vector.load %arg1[%c0, %c0_0] : memref<8x128xf32, #tpu.memory_space<vmem>>, vector<8x128xf32>
    %1 = arith.truncf %0 : vector<8x128xf32> to vector<8x128xbf16>
    %c0_1 = arith.constant 0 : index
    %c0_2 = arith.constant 0 : index
    %2 = vector.load %arg2[%c0_1, %c0_2] : memref<128x128xbf16, #tpu.memory_space<vmem>>, vector<128x128xbf16>
    %cst = arith.constant dense<0.000000e+00> : vector<8x128xf32>
    %3 = tpu.matmul %1, %2, %cst {dimension_numbers = #tpu.dot_dimension_numbers<[1], [0], [0], [1], [0, 0, 1, 1], [], []>} : vector<8x128xbf16>, vector<128x128xbf16>, vector<8x128xf32> -> vector<8x128xf32>
    %c0_3 = arith.constant 0 : index
    %c0_4 = arith.constant 0 : index
    %4 = vector.load %arg3[%c0_3, %c0_4] : memref<1x128xf32, #tpu.memory_space<vmem>>, vector<1x128xf32>
    %5 = vector.broadcast %4 : vector<1x128xf32> to vector<8x128xf32>
    %6 = arith.addf %3, %5 : vector<8x128xf32>
    %cst_5 = arith.constant 0.000000e+00 : f32
    %7 = vector.broadcast %cst_5 : f32 to vector<8x128xf32>
    %8 = arith.maximumf %6, %7 : vector<8x128xf32>
    %9 = arith.truncf %8 : vector<8x128xf32> to vector<8x128xbf16>
    %c0_6 = arith.constant 0 : index
    %c0_7 = arith.constant 0 : index
    %10 = vector.load %arg4[%c0_6, %c0_7] : memref<128x256xbf16, #tpu.memory_space<vmem>>, vector<128x256xbf16>
    %cst_8 = arith.constant dense<0.000000e+00> : vector<8x256xf32>
    %11 = tpu.matmul %9, %10, %cst_8 {dimension_numbers = #tpu.dot_dimension_numbers<[1], [0], [0], [1], [0, 0, 1, 1], [], []>} : vector<8x128xbf16>, vector<128x256xbf16>, vector<8x256xf32> -> vector<8x256xf32>
    %c0_9 = arith.constant 0 : index
    %c0_10 = arith.constant 0 : index
    %12 = vector.load %arg5[%c0_9, %c0_10] : memref<1x256xf32, #tpu.memory_space<vmem>>, vector<1x256xf32>
    %13 = vector.broadcast %12 : vector<1x256xf32> to vector<8x256xf32>
    %14 = arith.addf %11, %13 : vector<8x256xf32>
    %cst_11 = arith.constant 0.000000e+00 : f32
    %15 = vector.broadcast %cst_11 : f32 to vector<8x256xf32>
    %16 = arith.maximumf %14, %15 : vector<8x256xf32>
    %17 = arith.truncf %16 : vector<8x256xf32> to vector<8x256xbf16>
    %c0_12 = arith.constant 0 : index
    %c0_13 = arith.constant 0 : index
    %18 = vector.load %arg6[%c0_12, %c0_13] : memref<256x512xbf16, #tpu.memory_space<vmem>>, vector<256x512xbf16>
    %cst_14 = arith.constant dense<0.000000e+00> : vector<8x512xf32>
    %19 = tpu.matmul %17, %18, %cst_14 {dimension_numbers = #tpu.dot_dimension_numbers<[1], [0], [0], [1], [0, 0, 1, 1], [], []>} : vector<8x256xbf16>, vector<256x512xbf16>, vector<8x512xf32> -> vector<8x512xf32>
    %c0_15 = arith.constant 0 : index
    %c0_16 = arith.constant 0 : index
    %20 = vector.load %arg7[%c0_15, %c0_16] : memref<1x512xf32, #tpu.memory_space<vmem>>, vector<1x512xf32>
    %21 = vector.broadcast %20 : vector<1x512xf32> to vector<8x512xf32>
    %22 = arith.addf %19, %21 : vector<8x512xf32>
    %cst_17 = arith.constant 0.000000e+00 : f32
    %23 = vector.broadcast %cst_17 : f32 to vector<8x512xf32>
    %24 = arith.maximumf %22, %23 : vector<8x512xf32>
    %25 = arith.truncf %24 : vector<8x512xf32> to vector<8x512xbf16>
    %c0_18 = arith.constant 0 : index
    %c0_19 = arith.constant 0 : index
    %26 = vector.load %arg8[%c0_18, %c0_19] : memref<512x128xbf16, #tpu.memory_space<vmem>>, vector<512x128xbf16>
    %cst_20 = arith.constant dense<0.000000e+00> : vector<8x128xf32>
    %27 = tpu.matmul %25, %26, %cst_20 {dimension_numbers = #tpu.dot_dimension_numbers<[1], [0], [0], [1], [0, 0, 1, 1], [], []>} : vector<8x512xbf16>, vector<512x128xbf16>, vector<8x128xf32> -> vector<8x128xf32>
    %c0_21 = arith.constant 0 : index
    %c0_22 = arith.constant 0 : index
    %28 = vector.load %arg9[%c0_21, %c0_22] : memref<1x128xf32, #tpu.memory_space<vmem>>, vector<1x128xf32>
    %29 = vector.broadcast %28 : vector<1x128xf32> to vector<8x128xf32>
    %30 = arith.addf %27, %29 : vector<8x128xf32>
    %cst_23 = arith.constant 0.000000e+00 : f32
    %31 = vector.broadcast %cst_23 : f32 to vector<8x128xf32>
    %32 = arith.subf %31, %30 : vector<8x128xf32>
    %33 = math.exp %32 : vector<8x128xf32>
    %cst_24 = arith.constant 1.000000e+00 : f32
    %34 = vector.broadcast %cst_24 : f32 to vector<8x128xf32>
    %35 = arith.addf %34, %33 : vector<8x128xf32>
    %36 = tpu.reciprocal %35 {approx = true} : vector<8x128xf32> -> vector<8x128xf32>
    %c0_25 = arith.constant 0 : index
    %c0_26 = arith.constant 0 : index
    %37 = vector.load %arg10[%c0_25, %c0_26] : memref<8x128xf32, #tpu.memory_space<vmem>>, vector<8x128xf32>
    tpu.vector_store %arg10[%c0_25, %c0_26], %36 {strides = array<i32>} : memref<8x128xf32, #tpu.memory_space<vmem>>, vector<8x128xf32>,
    return
  }
  func.func @transform_0(%arg0: i32) -> (i32, i32) {
    %c0_i32 = arith.constant 0 : i32
    %c0_i32_0 = arith.constant 0 : i32
    return %arg0, %c0_i32 : i32, i32
  }
  func.func @transform_1(%arg0: i32) -> (i32, i32) {
    %c0_i32 = arith.constant 0 : i32
    %c0_i32_0 = arith.constant 0 : i32
    %c0_i32_1 = arith.constant 0 : i32
    return %c0_i32, %c0_i32_0 : i32, i32
  }
  func.func @transform_2(%arg0: i32) -> (i32, i32) {
    %c0_i32 = arith.constant 0 : i32
    %c0_i32_0 = arith.constant 0 : i32
    %c0_i32_1 = arith.constant 0 : i32
    return %c0_i32, %c0_i32_0 : i32, i32
  }
  func.func @transform_3(%arg0: i32) -> (i32, i32) {
    %c0_i32 = arith.constant 0 : i32
    %c0_i32_0 = arith.constant 0 : i32
    %c0_i32_1 = arith.constant 0 : i32
    return %c0_i32, %c0_i32_0 : i32, i32
  }
  func.func @transform_4(%arg0: i32) -> (i32, i32) {
    %c0_i32 = arith.constant 0 : i32
    %c0_i32_0 = arith.constant 0 : i32
    %c0_i32_1 = arith.constant 0 : i32
    return %c0_i32, %c0_i32_0 : i32, i32
  }
  func.func @transform_5(%arg0: i32) -> (i32, i32) {
    %c0_i32 = arith.constant 0 : i32
    %c0_i32_0 = arith.constant 0 : i32
    %c0_i32_1 = arith.constant 0 : i32
    return %c0_i32, %c0_i32_0 : i32, i32
  }
  func.func @transform_6(%arg0: i32) -> (i32, i32) {
    %c0_i32 = arith.constant 0 : i32
    %c0_i32_0 = arith.constant 0 : i32
    %c0_i32_1 = arith.constant 0 : i32
    return %c0_i32, %c0_i32_0 : i32, i32
  }
  func.func @transform_7(%arg0: i32) -> (i32, i32) {
    %c0_i32 = arith.constant 0 : i32
    %c0_i32_0 = arith.constant 0 : i32
    %c0_i32_1 = arith.constant 0 : i32
    return %c0_i32, %c0_i32_0 : i32, i32
  }
  func.func @transform_8(%arg0: i32) -> (i32, i32) {
    %c0_i32 = arith.constant 0 : i32
    %c0_i32_0 = arith.constant 0 : i32
    %c0_i32_1 = arith.constant 0 : i32
    return %c0_i32, %c0_i32_0 : i32, i32
  }
  func.func @transform_9(%arg0: i32) -> (i32, i32) {
    %c0_i32 = arith.constant 0 : i32
    %c0_i32_0 = arith.constant 0 : i32
    return %arg0, %c0_i32 : i32, i32
  }
}

</mosaic_0001>

<bundles_post_ra>
// kernel: tpu_custom_call.1
= control target key start
LH: loop header
LB: loop body
LE: loop exit
PB: predicated region body
PF: predicated region fallthrough
CT: control target
= control target key end

     0   :  { %s2630_s0 = inlined_call_operand.hbm [shape: f32[32,128], index: 0, kind: input, shape index: {}]   ;;  %s2631_s1 = inlined_call_operand.hbm [shape: bf16[128,128], index: 1, kind: input, shape index: {}]   ;;  %s2632_s2 = inlined_call_operand.vmem [shape: f32[1,128], index: 2, kind: input, shape index: {}]   ;;  %s2633_s3 = inlined_call_operand.hbm [shape: bf16[128,256], index: 3, kind: input, shape index: {}]   ;;  %s2634_s4 = inlined_call_operand.vmem [shape: f32[1,256], index: 4, kind: input, shape index: {}]   ;;  %s2635_s5 = inlined_call_operand.hbm [shape: bf16[256,512], index: 5, kind: input, shape index: {}]   ;;  %s2636_s6 = inlined_call_operand.vmem [shape: f32[1,512], index: 6, kind: input, shape index: {}]   ;;  %s2637_s7 = inlined_call_operand.hbm [shape: bf16[512,128], index: 7, kind: input, shape index: {}]   ;;  %s2638_s8 = inlined_call_operand.vmem [shape: f32[1,128], index: 8, kind: input, shape index: {}]   ;;  %s2639_s9 = inlined_call_operand.hbm [shape: f32[32,128], index: 9, kind: output, shape index: {}]  }
   0x1   :  { %2644 = sst [smem:[#allocation16_spill]] %s2631_s1 }
   0x2   :  { %2645 = sst [smem:[#allocation17_spill]] %s2633_s3 }
   0x3   :  { %2646 = sst [smem:[#allocation18_spill]] %s2635_s5 }
   0x4   :  { %2647 = sst [smem:[#allocation19_spill]] %s2637_s7 }
   0x5   :  { %14 = vsyncpa [#allocation3], 0 }
   0x6   :  { %16 = vsyncpa [#allocation3 + $0x1], 0 }
   0x7   :  { %17 = vsyncpa [#allocation6], 0 }
   0x8   :  { %18 = vsyncpa [#allocation9], 0 }
   0x9   :  { %19 = vsyncpa [#allocation4], 0 }
   0xa   :  { %21 = vsyncpa [#allocation4 + $0x1], 0  ;;  %s2388_s30 = smov 0   ;;  %s2390_s10 = smov 0  }
   0xb   :  { %s2392_s11 = smov 0   ;;  %s2394_s12 = smov 0  }
   0xc LB: > { %s2323_s13 = smov [#allocation5]   ;;  %s2409_s15 = sadd.s32 4294967295, %s2321_s12   ;;  %s2321_s12 = sphi %s2394_s12, %s2670_s12   ;;  %s2317_s11 = sphi %s2392_s11, %s2669_s11   ;;  %s2313_s10 = sphi %s2390_s10, %s2668_s10   ;;  %s2309_s30 = sphi %s2388_s30, %s2667_s30  }
   0xd   : > { %s264_s14 = sshll.u32 %s2323_s13, 4  ;;  %p1643_p0 = scmp.ge.s32.totalorder %s2321_s12, 1  ;;  %s265_s14 = int_to_ptr.vmem [resolvable:$true] %s264_s14 }
   0xe   : > { %p2640_p1 = scmp.eq.s32.totalorder %s2409_s15, 0  ;;  %p252_p2 = scmp.lt.s32.totalorder %s2321_s12, 5 }
   0xf   : > { %s2324_s17 = smov [#allocation8]   ;;  %s2325_s20 = smov [#allocation7]  }
  0x10   : > { %p2414_p3 = pnand %p1643_p0, %p252_p2  ;;  %s296_s18 = sshll.u32 %s2324_s17, 4  ;;  %s2426_s18 = int_to_ptr.vmem [resolvable:$true] %s296_s18 }
  0x11   : > { %s2428_s21 = sshll.u32 %s2325_s20, 4  ;;  %s2128_s22 = scalar_lea.vmem %s265_s14, 1024  ;;  %s281_s21 = int_to_ptr.vmem [resolvable:$true] %s2428_s21 }
  0x12   : > { %s2648_s16 = scalar_select %p2414_p3, 1, 0 }
  0x13   : > { %p1877_p4 = pneg %p2414_p3  ;;  %p2129_p7 = scmp.ne.s32.totalorder %s265_s14, %s2128_s22 }
  0x14   : > { %p2136_p10 = scmp.lt.s32.totalorder %s265_s14, %s265_s14  ;;  %p2137_p11 = scmp.lt.s32.totalorder %s2128_s22, %s2128_s22 }
  0x15   : > { %p2422_p5 = pnand %p1877_p4, %p2640_p1 }
  0x16   : > { %p2138_p12 = por %p2137_p11, %p2136_p10 }
  0x17   : > { %p2119_p6 = pneg %p2422_p5 }
  0x19   : > { %p2131_p8 = pnand %p2129_p7, %p2119_p6 }
  0x1b   : > { %p2132_p9 = pneg %p2131_p8 }
  0x1d   : > { %p2139_p13 = pnand %p2138_p12, %p2132_p9 }
  0x1f   : > { %2142 = shalt.err (!%p2139_p13)
}
  0x20   : > { %s2326_s23 = smov 64   ;;  %s2327_s24 = smov 4  }
  0x21   : > { %s2650_s1 = sld [smem:[#allocation16_spill]]  ;;  %s2154_s27 = scalar_lea.vmem %s2426_s18, 8192 }
  0x22   : > { %p2155_p0 = scmp.ne.s32.totalorder %s2426_s18, %s2154_s27  ;;  %p2162_p7 = scmp.lt.s32.totalorder %s2426_s18, %s2426_s18 }
  0x23   : > { %p2163_p8 = scmp.lt.s32.totalorder %s2154_s27, %s2154_s27 }
  0x24   : > { %p2157_p2 = pnand %p2155_p0, %p2119_p6 }
  0x25   : > { %p2164_p9 = por %p2163_p8, %p2162_p7 }
  0x26   : > { %p2158_p4 = pneg %p2157_p2 }
  0x27   : > { %1880 = dma.hbm_to_vmem [thread:$0]  (!%p2422_p5), %s2650_s1, 1024, %s265_s14, [#allocation6], %s2326_s23, %s2326_s23, %s2327_s24  }
  0x28   : > { %p2165_p10 = pnand %p2164_p9, %p2158_p4 }
  0x2a   : > { %2168 = shalt.err (!%p2165_p10)
}
  0x2b   : > { %s2328_s28 = smov 256   ;;  %s2329_s29 = smov 16  }
  0x2c   : > { %s2651_s5 = sld [smem:[#allocation18_spill]]  ;;  %s2180_s17 = scalar_lea.vmem %s281_s21, 2048 }
  0x2d   : > { %p2181_p11 = scmp.ne.s32.totalorder %s281_s21, %s2180_s17  ;;  %p2188_p0 = scmp.lt.s32.totalorder %s281_s21, %s281_s21 }
  0x2e   : > { %p2189_p2 = scmp.lt.s32.totalorder %s2180_s17, %s2180_s17 }
  0x2f   : > { %p2183_p12 = pnand %p2181_p11, %p2119_p6 }
  0x30   : > { %p2190_p4 = por %p2189_p2, %p2188_p0 }
  0x31   : > { %p2184_p13 = pneg %p2183_p12 }
  0x32   : > { %1886 = dma.hbm_to_vmem [thread:$0]  (!%p2422_p5), %s2651_s5, 8192, %s2426_s18, [#allocation9], %s2328_s28, %s2328_s28, %s2329_s29  }
  0x33   : > { %p2191_p7 = pnand %p2190_p4, %p2184_p13 }
  0x35   : > { %2194 = shalt.err (!%p2191_p7)
}
  0x36   : > { %s2330_s20 = smov 128   ;;  %s2331_s22 = smov 8  }
  0x37   : > { %s2652_s3 = sld [smem:[#allocation17_spill]]  ;;  %s2332_s18 = smov [#allocation10]  }
  0x38   : > { %s312_s27 = sshll.u32 %s2332_s18, 4  ;;  %s313_s27 = int_to_ptr.vmem [resolvable:$true] %s312_s27 }
  0x39   : > { %s2206_s28 = scalar_lea.vmem %s313_s27, 4096  ;;  %p2214_p11 = scmp.lt.s32.totalorder %s313_s27, %s313_s27 }
  0x3a   : > { %p2207_p8 = scmp.ne.s32.totalorder %s313_s27, %s2206_s28  ;;  %p2215_p12 = scmp.lt.s32.totalorder %s2206_s28, %s2206_s28 }
  0x3c   : > { %p2209_p9 = pnand %p2207_p8, %p2119_p6  ;;  %p2216_p13 = por %p2215_p12, %p2214_p11 }
  0x3d   : > { %1883 = dma.hbm_to_vmem [thread:$0]  (!%p2422_p5), %s2652_s3, 2048, %s281_s21, [#allocation6], %s2330_s20, %s2330_s20, %s2331_s22  }
  0x3e   : > { %p2210_p10 = pneg %p2209_p9 }
  0x40   : > { %p2217_p0 = pnand %p2216_p13, %p2210_p10 }
  0x42   : > { %2220 = shalt.err (!%p2217_p0)
}
  0x43   : > { %s2653_s7 = sld [smem:[#allocation19_spill]]  ;;  %s1642_s19 = sadd.s32 4294967294, %s2321_s12  }
  0x44   : > { %s2478_s13 = sadd.s32 1, %s2321_s12   ;;  %s34_s17 = sadd.s32 1, %s2317_s11 }
  0x45   : > { %s31_s14 = ssub.s32 %s2321_s12, %s2478_s13  ;;  %p41_p2 = scmp.ne.s32.totalorder %s2317_s11, %s2313_s10 }
  0x46   : > { %p32_p6 = scmp.eq.s32.totalorder %s31_s14, 0  ;;  %p42_p4 = scmp.eq.s32.totalorder %s2321_s12, 0 }
  0x47   : > { %p47_p7 = scmp.ne.s32.totalorder %s2313_s10, %s2309_s30  ;;  %p239_p9 = scmp.eq.s32.totalorder %s2409_s15, 3 }
  0x48   : > { %s2489_s20 = scalar_select %p32_p6, %s2317_s11, %s34_s17  }
  0x49   : > { %1889 = dma.hbm_to_vmem [thread:$0]  (!%p2422_p5), %s2653_s7, 4096, %s313_s27, [#allocation9], %s2326_s23, %s2326_s23, %s2327_s24  }
  0x4a   : > { %p2491_p8 = por %p42_p4, %p41_p2  ;;  %p2497_p5 = por %p2640_p1, %p47_p7 }
  0x4b   : > { %p245_p10 = scmp.eq.s32.totalorder %s1642_s19, 3  ;;  %p1902_p11 = scmp.lt.s32.totalorder %s2321_s12, 4 }
  0x4c   : > { %s2655_s23 = scalar_select %p2497_p5, 1, 0 }
  0x4d   : > { %s329_s24 = sand.u32 1, %s2317_s11   ;;  %p2504_p12 = por %p239_p9, %p41_p2 }
  0x4e   : > { %p2508_p13 = por %p245_p10, %p47_p7  ;;  %s1649_s18 = sshll.u32 %s329_s24, 3 }
  0x4f   : > { %s2656_s25 = scalar_select %p2504_p12, 1, 0 }
  0x50   : > { %s2657_s26 = scalar_select %p2508_p13, 1, 0 }
  0x51   : > { %s1650_s27 = sshll.u32 %s2321_s12, 7  ;;  %s333_s19 = scalar_lea.vmem [#allocation2], %s1649_s18 }
  0x52   : > { %s2516_s29 = scalar_lea.hbm %s2630_s0, %s1650_s27  ;;  %s340_s14 = sshll.u32 %s333_s19, 4  ;;  %s341_s14 = int_to_ptr.vmem [resolvable:$true] %s340_s14 }
  0x53   : > { %p2520_p0 = pnand %p1902_p11, %p2491_p8  ;;  %s330_s1 = scalar_lea.sflag [#allocation3], %s329_s24 }
  0x54   : > { %s2221_s3 = scalar_lea.hbm %s2516_s29, 128  ;;  %s2226_s21 = scalar_lea.hbm %s2630_s0, 512 }
  0x55   : > { %p2222_p6 = scmp.ne.s32.totalorder %s2516_s29, %s2221_s3  ;;  %p2223_p2 = pneg %p2520_p0 }
  0x56   : > { %p2227_p9 = scmp.lt.s32.totalorder %s2516_s29, %s2630_s0  ;;  %p2228_p8 = scmp.lt.s32.totalorder %s2226_s21, %s2221_s3 }
  0x57   : > { %p2224_p4 = pnand %p2223_p2, %p2222_p6 }
  0x58   : > { %p2229_p10 = por %p2228_p8, %p2227_p9 }
  0x59   : > { %p2225_p7 = pneg %p2224_p4 }
  0x5b   : > { %p2230_p11 = pnand %p2229_p10, %p2225_p7 }
  0x5d   : > { %2233 = shalt.err (!%p2230_p11)
}
  0x5e   : > { %s2234_s22 = scalar_lea.vmem %s341_s14, 128  ;;  %s2333_s24 = smov [#allocation2]  }
  0x5f   : > { %p2235_p1 = scmp.ne.s32.totalorder %s341_s14, %s2234_s22  ;;  %s2239_s5 = sshll.u32 %s2333_s24, 4  ;;  %s2240_s5 = int_to_ptr.vmem [resolvable:$false] %s2239_s5 }
  0x60   : > { %s2241_s7 = scalar_lea.vmem %s2240_s5, 256  ;;  %p2242_p6 = scmp.lt.s32.totalorder %s341_s14, %s2240_s5 }
  0x61   : > { %p2237_p13 = pnand %p2235_p1, %p2223_p2  ;;  %p2243_p4 = scmp.lt.s32.totalorder %s2241_s7, %s2234_s22 }
  0x63   : > { %p2238_p12 = pneg %p2237_p13  ;;  %p2244_p5 = por %p2243_p4, %p2242_p6 }
  0x65   : > { %p2245_p3 = pnand %p2244_p5, %p2238_p12 }
  0x67   : > { %2248 = shalt.err (!%p2245_p3)
}
  0x68   : > { %1893 = dma.hbm_to_vmem [thread:$0]  (!%p2520_p0), %s2516_s29, 128, %s341_s14, %s330_s1  }
  0x69   : > { %p2659_p7 = scmp.ne.s32.totalorder %s2648_s16, 0 }
  0x6a   : > { %s2541_s3 = sand.u32 (!%p2659_p7), 1, %s2313_s10   ;;  %p2660_p1 = scmp.ne.s32.totalorder (!%p2659_p7), %s2655_s23, 0 }
  0x6b   : > { %349 = sbr.rel (%p2659_p7) target bundleno = 1003 (0x3eb), region = 56  ;;  %s1652_s27 = sshll.u32 (!%p2659_p7), %s2541_s3, 3 }
  0x6c   : > { %s352_s5 = scalar_lea.sflag (!%p2659_p7), [#allocation3], %s2541_s3  ;;  %s2547_s7 = scalar_lea.vmem (!%p2659_p7), [#allocation2], %s1652_s27 }
  0x70   : > { %2292 = dma.done.wait (%p2660_p1), %s352_s5, 128  }
  0x71   : > { %2294 = vsyncadd (%p2660_p1), %s352_s5, 4294967168  ;;  %p2661_p3 = scmp.eq.s32.totalorder %s2409_s15, 0 }
  0x73   : > { %2296 = dma.done.wait (%p2661_p3), [#allocation6], 3072   ;;  %p2662_p5 = pmov %p2661_p3 }
  0x74   : > { %p2663_p12 = pmov %p2661_p3 }
  0x75   : > { %2298 = vsyncadd (%p2662_p5), [#allocation6], 4294964224 }
  0x76   : > { %2300 = dma.done.wait (%p2663_p12), [#allocation9], 12288   ;;  %p2664_p13 = pmov %p2661_p3 }
  0x77   : > { %v2334_v0 = vmov 0.0   ;;  %vm2335_vm0 = vmmov 0   ;;  %v1953_v1 = vld [vmem:[#allocation5 + $0x38] sm:$0xff]   ;;  %v1954_v2 = vld [vmem:[#allocation5 + $0x30] sm:$0xff]   ;;  %v1955_v3 = vld [vmem:[#allocation5 + $0x28] sm:$0xff]   ;;  %v2336_v27 = vmov 0  }
  0x78   : > { %2302 = vsyncadd (%p2664_p13), [#allocation9], 4294955008  ;;  %1837 = vmatprep.subr.bf16.mxu0 %v2334_v0  ;;  %1853 = vmatprep.mubr.msk.bf16.mxu0 %vm2335_vm0, %v2334_v0  ;;  %v1961_v4 = vld [vmem:[#allocation7 + $0x74] ss:$8 sps:$4 sm:$0xff]   ;;  %v1963_v5 = vld [vmem:[#allocation7 + $0x70] ss:$8 sps:$4 sm:$0xff]  }
  0x79   : > { %1838 = vmatpush3.bf16.msra.mxu0 %v1953_v1  ;;  %v1956_v6 = vld [vmem:[#allocation5 + $0x20] sm:$0xff]   ;;  %630 = vmatprep.subr.bf16.mxu1 %v1961_v4  ;;  %v1967_v9 = vld [vmem:[#allocation7 + $0x54] ss:$8 sps:$4 sm:$0xff]   ;;  %v1969_v11 = vld [vmem:[#allocation7 + $0x50] ss:$8 sps:$4 sm:$0xff]   ;;  %s1781_s18 = sshll.u32 %s2409_s15, 7 }
  0x7a   : > { %1839 = vmatprep.subr.bf16.mxu0 %v2334_v0  ;;  %v1964_v7 = vld [vmem:[#allocation7 + $0x64] ss:$8 sps:$4 sm:$0xff]   ;;  %631 = vmatpush1.bf16.msra.mxu1 %v1963_v5  ;;  %v1966_v8 = vld [vmem:[#allocation7 + $0x60] ss:$8 sps:$4 sm:$0xff]   ;;  %v1957_v10 = vld [vmem:[#allocation5 + $0x18] sm:$0xff]   ;;  %s405_s19 = scalar_lea.vmem [#allocation11], %s1652_s27 }
  0x7b   : > { %632 = vmatprep.subr.bf16.mxu1 %v1964_v7  ;;  %v1958_v12 = vld [vmem:[#allocation5 + $0x10] sm:$0xff]   ;;  %v1970_v13 = vld [vmem:[#allocation7 + $0x44] ss:$8 sps:$4 sm:$0xff]   ;;  %v1972_v14 = vld [vmem:[#allocation7 + $0x40] ss:$8 sps:$4 sm:$0xff]   ;;  %662 = vmatprep.mubr.bf16.mxu1 %v2336_v27  ;;  %s1534_s22 = sshll.u32 %s405_s19, 4  ;;  %s1535_s22 = int_to_ptr.vmem [resolvable:$true] %s1534_s22 }
  0x7c   : > { %v1973_v15 = vld [vmem:[#allocation7 + $0x34] ss:$8 sps:$4 sm:$0xff]   ;;  %v1959_v16 = vld [vmem:[#allocation5 + $0x8] sm:$0xff]   ;;  %v1975_v17 = vld [vmem:[#allocation7 + $0x30] ss:$8 sps:$4 sm:$0xff]   ;;  %s1521_s1 = scalar_lea.sflag [#allocation4], %s2541_s3 }
  0x7d   : > { %1840 = vmatpush3.bf16.msra.mxu0 %v1954_v2  ;;  %v1976_v18 = vld [vmem:[#allocation7 + $0x24] ss:$8 sps:$4 sm:$0xff]   ;;  %v407_v20 = vld [vmem:[%s2547_s7] sm:$0xff]  ;;  %v1978_v21 = vld [vmem:[#allocation7 + $0x20] ss:$8 sps:$4 sm:$0xff]   ;;  %s2594_s7 = scalar_lea.hbm %s2639_s9, %s1781_s18  ;;  %s2249_s16 = scalar_lea.vmem %s1535_s22, 128 }
  0x7e   : > { %1841 = vmatprep.subr.bf16.mxu0 %v2334_v0  ;;  %633 = vmatpush1.bf16.msra.mxu1 %v1966_v8  ;;  %v1960_v19 = vld [vmem:[#allocation5] sm:$0xff]   ;;  %v1979_v22 = vld [vmem:[#allocation7 + $0x14] ss:$8 sps:$4 sm:$0xff]   ;;  %v408_v23 = vpack.c.bf16 %v407_v20, %v407_v20  ;;  %v1981_v24 = vld [vmem:[#allocation7 + $0x10] ss:$8 sps:$4 sm:$0xff]   ;;  %p2250_p0 = scmp.ne.s32.totalorder %s1535_s22, %s2249_s16  ;;  %p2665_p2 = scmp.ne.s32.totalorder %s2656_s25, 0 }
  0x7f   : > { %634 = vmatprep.subr.bf16.mxu1 %v1967_v9  ;;  %v1982_v25 = vld [vmem:[#allocation7 + $0x4] ss:$8 sps:$4 sm:$0xff]   ;;  %v1984_v26 = vld [vmem:[#allocation7] ss:$8 sps:$4 sm:$0xff]   ;;  %v1658_v57 = vld [vmem:[%s2632_s2] ss:$0 sm:$0xff] }
  0x80   : > { %v1985_v28 = vld [vmem:[#allocation8 + $0xe0] ss:$16 sps:$4 sm:$0xff]   ;;  %v1987_v29 = vld [vmem:[#allocation8 + $0xe4] ss:$16 sps:$4 sm:$0xff]   ;;  %v1990_v30 = vld [vmem:[#allocation8 + $0xec] ss:$16 sps:$4 sm:$0xff]   ;;  %p2251_p9 = pnand %p2250_p0, %p2665_p2 }
  0x81   : > { %1842 = vmatpush3.bf16.msra.mxu0 %v1955_v3  ;;  %v1993_v31 = vld [vmem:[#allocation8 + $0xc4] ss:$16 sps:$4 sm:$0xff]   ;;  %v1991_v32 = vld [vmem:[#allocation8 + $0xc0] ss:$16 sps:$4 sm:$0xff]   ;;  %v1988_v63 = vld [vmem:[#allocation8 + $0xe8] ss:$16 sps:$4 sm:$0xff]  }
  0x82   : > { %1843 = vmatprep.subr.bf16.mxu0 %v2334_v0  ;;  %635 = vmatpush1.bf16.msra.mxu1 %v1969_v11  ;;  %v1999_v33 = vld [vmem:[#allocation8 + $0xa4] ss:$16 sps:$4 sm:$0xff]   ;;  %v1997_v34 = vld [vmem:[#allocation8 + $0xa0] ss:$16 sps:$4 sm:$0xff]   ;;  %v1996_v1 = vld [vmem:[#allocation8 + $0xcc] ss:$16 sps:$4 sm:$0xff]   ;;  %p2252_p8 = pneg %p2251_p9 }
  0x83   : > { %636 = vmatprep.subr.bf16.mxu1 %v1970_v13  ;;  %v2005_v35 = vld [vmem:[#allocation8 + $0x84] ss:$16 sps:$4 sm:$0xff]   ;;  %v2003_v36 = vld [vmem:[#allocation8 + $0x80] ss:$16 sps:$4 sm:$0xff]   ;;  %v1994_v3 = vld [vmem:[#allocation8 + $0xc8] ss:$16 sps:$4 sm:$0xff]  }
  0x84   : > { %v2011_v37 = vld [vmem:[#allocation8 + $0x64] ss:$16 sps:$4 sm:$0xff]   ;;  %v2009_v38 = vld [vmem:[#allocation8 + $0x60] ss:$16 sps:$4 sm:$0xff]   ;;  %v2002_v4 = vld [vmem:[#allocation8 + $0xac] ss:$16 sps:$4 sm:$0xff]  }
  0x85   : > { %1844 = vmatpush3.bf16.msra.mxu0 %v1956_v6  ;;  %v2017_v39 = vld [vmem:[#allocation8 + $0x44] ss:$16 sps:$4 sm:$0xff]   ;;  %v2015_v40 = vld [vmem:[#allocation8 + $0x40] ss:$16 sps:$4 sm:$0xff]   ;;  %v2000_v5 = vld [vmem:[#allocation8 + $0xa8] ss:$16 sps:$4 sm:$0xff]  }
  0x86   : > { %1845 = vmatprep.subr.bf16.mxu0 %v2334_v0  ;;  %637 = vmatpush1.bf16.msra.mxu1 %v1972_v14  ;;  %v2023_v41 = vld [vmem:[#allocation8 + $0x24] ss:$16 sps:$4 sm:$0xff]   ;;  %v2021_v42 = vld [vmem:[#allocation8 + $0x20] ss:$16 sps:$4 sm:$0xff]   ;;  %v2008_v6 = vld [vmem:[#allocation8 + $0x8c] ss:$16 sps:$4 sm:$0xff]  }
  0x87   : > { %638 = vmatprep.subr.bf16.mxu1 %v1973_v15  ;;  %v2029_v43 = vld [vmem:[#allocation8 + $0x4] ss:$16 sps:$4 sm:$0xff]   ;;  %v2027_v44 = vld [vmem:[#allocation8] ss:$16 sps:$4 sm:$0xff]   ;;  %v2006_v7 = vld [vmem:[#allocation8 + $0x88] ss:$16 sps:$4 sm:$0xff]  }
  0x88   : > { %v2035_v45 = vld [vmem:[#allocation8 + $0x1e4] ss:$16 sps:$4 sm:$0xff]   ;;  %v2033_v46 = vld [vmem:[#allocation8 + $0x1e0] ss:$16 sps:$4 sm:$0xff]   ;;  %v2014_v8 = vld [vmem:[#allocation8 + $0x6c] ss:$16 sps:$4 sm:$0xff]  }
  0x89   : > { %1846 = vmatpush3.bf16.msra.mxu0 %v1957_v10  ;;  %v2041_v47 = vld [vmem:[#allocation8 + $0x1c4] ss:$16 sps:$4 sm:$0xff]   ;;  %v2039_v48 = vld [vmem:[#allocation8 + $0x1c0] ss:$16 sps:$4 sm:$0xff]   ;;  %v2012_v9 = vld [vmem:[#allocation8 + $0x68] ss:$16 sps:$4 sm:$0xff]  }
  0x8a   : > { %1847 = vmatprep.subr.bf16.mxu0 %v2334_v0  ;;  %639 = vmatpush1.bf16.msra.mxu1 %v1975_v17  ;;  %v2047_v49 = vld [vmem:[#allocation8 + $0x1a4] ss:$16 sps:$4 sm:$0xff]   ;;  %v2045_v50 = vld [vmem:[#allocation8 + $0x1a0] ss:$16 sps:$4 sm:$0xff]   ;;  %v2020_v10 = vld [vmem:[#allocation8 + $0x4c] ss:$16 sps:$4 sm:$0xff]  }
  0x8b   : > { %640 = vmatprep.subr.bf16.mxu1 %v1976_v18  ;;  %v2053_v51 = vld [vmem:[#allocation8 + $0x184] ss:$16 sps:$4 sm:$0xff]   ;;  %v2051_v52 = vld [vmem:[#allocation8 + $0x180] ss:$16 sps:$4 sm:$0xff]   ;;  %v2018_v11 = vld [vmem:[#allocation8 + $0x48] ss:$16 sps:$4 sm:$0xff]  }
  0x8c   : > { %v2059_v53 = vld [vmem:[#allocation8 + $0x164] ss:$16 sps:$4 sm:$0xff]   ;;  %v2057_v54 = vld [vmem:[#allocation8 + $0x160] ss:$16 sps:$4 sm:$0xff]   ;;  %v2024_v13 = vld [vmem:[#allocation8 + $0x28] ss:$16 sps:$4 sm:$0xff]  }
  0x8d   : > { %1848 = vmatpush3.bf16.msra.mxu0 %v1958_v12  ;;  %v2065_v55 = vld [vmem:[#allocation8 + $0x144] ss:$16 sps:$4 sm:$0xff]   ;;  %v2063_v56 = vld [vmem:[#allocation8 + $0x140] ss:$16 sps:$4 sm:$0xff]   ;;  %v2026_v12 = vld [vmem:[#allocation8 + $0x2c] ss:$16 sps:$4 sm:$0xff]  }
  0x8e   : > { %1849 = vmatprep.subr.bf16.mxu0 %v2334_v0  ;;  %641 = vmatpush1.bf16.msra.mxu1 %v1978_v21  ;;  %v2032_v14 = vld [vmem:[#allocation8 + $0xc] ss:$16 sps:$4 sm:$0xff]   ;;  %v2030_v15 = vld [vmem:[#allocation8 + $0x8] ss:$16 sps:$4 sm:$0xff]   ;;  %s2337_s23 = smov [#allocation11]  }
  0x8f   : > { %642 = vmatprep.subr.bf16.mxu1 %v1979_v22  ;;  %v2036_v17 = vld [vmem:[#allocation8 + $0x1e8] ss:$16 sps:$4 sm:$0xff]   ;;  %v2044_v18 = vld [vmem:[#allocation8 + $0x1cc] ss:$16 sps:$4 sm:$0xff]   ;;  %s2253_s29 = sshll.u32 %s2337_s23, 4  ;;  %s2254_s29 = int_to_ptr.vmem [resolvable:$false] %s2253_s29 }
  0x90   : > { %v2050_v20 = vld [vmem:[#allocation8 + $0x1ac] ss:$16 sps:$4 sm:$0xff]   ;;  %v2048_v21 = vld [vmem:[#allocation8 + $0x1a8] ss:$16 sps:$4 sm:$0xff]   ;;  %s2255_s15 = scalar_lea.vmem %s2254_s29, 256  ;;  %p2256_p10 = scmp.lt.s32.totalorder %s1535_s22, %s2254_s29 }
  0x91   : > { %1850 = vmatpush3.bf16.msra.mxu0 %v1959_v16  ;;  %v2038_v16 = vld [vmem:[#allocation8 + $0x1ec] ss:$16 sps:$4 sm:$0xff]   ;;  %v2066_v27 = vld [vmem:[#allocation8 + $0x148] ss:$16 sps:$4 sm:$0xff]   ;;  %p2257_p11 = scmp.lt.s32.totalorder %s2255_s15, %s2249_s16 }
  0x92   : > { %1851 = vmatprep.subr.bf16.mxu0 %v2334_v0  ;;  %643 = vmatpush1.bf16.msra.mxu1 %v1981_v24  ;;  %v2056_v22 = vld [vmem:[#allocation8 + $0x18c] ss:$16 sps:$4 sm:$0xff]  }
  0x93   : > { %644 = vmatprep.subr.bf16.mxu1 %v1982_v25  ;;  %v2062_v24 = vld [vmem:[#allocation8 + $0x16c] ss:$16 sps:$4 sm:$0xff]   ;;  %v2060_v25 = vld [vmem:[#allocation8 + $0x168] ss:$16 sps:$4 sm:$0xff]   ;;  %p2258_p6 = por %p2257_p11, %p2256_p10 }
  0x95   : > { %1852 = vmatpush3.bf16.msra.mxu0 %v1960_v19  ;;  %v2042_v19 = vld [vmem:[#allocation8 + $0x1c8] ss:$16 sps:$4 sm:$0xff]   ;;  %p2259_p4 = pnand %p2258_p6, %p2252_p8 }
  0x96   : > { %645 = vmatpush1.bf16.msra.mxu1 %v1984_v26  ;;  %1081 = vmatprep.subr.bf16.mxu0 %v1987_v29  ;;  %v2068_v26 = vld [vmem:[#allocation8 + $0x14c] ss:$16 sps:$4 sm:$0xff]  }
  0x97   : > { %1122 = vmatprep.subr.bf16.mxu1 %v1990_v30  ;;  %v2074_v29 = vld [vmem:[#allocation8 + $0x12c] ss:$16 sps:$4 sm:$0xff]   ;;  %v2069_v30 = vld [vmem:[#allocation8 + $0x120] ss:$16 sps:$4 sm:$0xff]  }
  0x98   : > { %1854 = vmatmul.mubr.bf16.vlgmr.msra.gmra.mxu0 %v408_v23  ;;  %v2054_v23 = vld [vmem:[#allocation8 + $0x188] ss:$16 sps:$4 sm:$0xff]  }
  0x99   : > { %1082 = vmatpush1.bf16.msra.mxu0 %v1985_v28  ;;  %v2071_v28 = vld [vmem:[#allocation8 + $0x124] ss:$16 sps:$4 sm:$0xff]  }
  0x9a   : > { %1083 = vmatprep.subr.bf16.mxu0 %v1993_v31  ;;  %v2072_v31 = vld [vmem:[#allocation8 + $0x128] ss:$16 sps:$4 sm:$0xff]  }
  0x9d   : > { %1084 = vmatpush1.bf16.msra.mxu0 %v1991_v32  ;;  %v2077_v32 = vld [vmem:[#allocation8 + $0x104] ss:$16 sps:$4 sm:$0xff]  }
  0x9e   : > { %1085 = vmatprep.subr.bf16.mxu0 %v1999_v33  ;;  %v2080_v33 = vld [vmem:[#allocation8 + $0x10c] ss:$16 sps:$4 sm:$0xff]  }
  0xa1   : > { %1086 = vmatpush1.bf16.msra.mxu0 %v1997_v34  ;;  %v2075_v34 = vld [vmem:[#allocation8 + $0x100] ss:$16 sps:$4 sm:$0xff]  }
  0xa2   : > { %1087 = vmatprep.subr.bf16.mxu0 %v2005_v35  ;;  %v2078_v35 = vld [vmem:[#allocation8 + $0x108] ss:$16 sps:$4 sm:$0xff]  }
  0xa5   : > { %1088 = vmatpush1.bf16.msra.mxu0 %v2003_v36  ;;  %v2081_v36 = vld [vmem:[#allocation10 + $0x78] sm:$0xff]  }
  0xa6   : > { %1089 = vmatprep.subr.bf16.mxu0 %v2011_v37  ;;  %v2082_v37 = vld [vmem:[#allocation10 + $0xf8] sm:$0xff]  }
  0xa9   : > { %1090 = vmatpush1.bf16.msra.mxu0 %v2009_v38  ;;  %v540_v38 = vlaneseq }
  0xaa   : > { %1091 = vmatprep.subr.bf16.mxu0 %v2017_v39 }
  0xab   : > { %v2565_v39 = vshrl.u32 %v540_v38, 7 }
  0xad   : > { %1092 = vmatpush1.bf16.msra.mxu0 %v2015_v40  ;;  %v542_v40 = vsub.s32 0, %v2565_v39 }
  0xae   : > { %1093 = vmatprep.subr.bf16.mxu0 %v2023_v41  ;;  %v538_v41 = vld [vmem:[%s2634_s4] sm:$0x3] }
  0xb1   : > { %1094 = vmatpush1.bf16.msra.mxu0 %v2021_v42  ;;  %v546_v42 = vsub.s32 1, %v2565_v39 }
  0xb2   : > { %1095 = vmatprep.subr.bf16.mxu0 %v2029_v43  ;;  %v543_v43 = vrot.slane %v538_v41, %v542_v40 }
  0xb5   : > { %1096 = vmatpush1.bf16.msra.mxu0 %v2027_v44  ;;  %v547_v44 = vrot.slane %v538_v41, %v546_v42 }
  0xb6   : > { %1097 = vmatprep.subr.bf16.mxu0 %v2035_v45 }
  0xb9   : > { %1098 = vmatpush2.bf16.msra.mxu0 %v2033_v46 }
  0xba   : > { %1099 = vmatprep.subr.bf16.mxu0 %v2041_v47 }
  0xbd   : > { %1100 = vmatpush2.bf16.msra.mxu0 %v2039_v48 }
  0xbe   : > { %1101 = vmatprep.subr.bf16.mxu0 %v2047_v49 }
  0xc1   : > { %1102 = vmatpush2.bf16.msra.mxu0 %v2045_v50 }
  0xc2   : > { %1103 = vmatprep.subr.bf16.mxu0 %v2053_v51 }
  0xc5   : > { %1104 = vmatpush2.bf16.msra.mxu0 %v2051_v52 }
  0xc6   : > { %1105 = vmatprep.subr.bf16.mxu0 %v2059_v53 }
  0xc9   : > { %1106 = vmatpush2.bf16.msra.mxu0 %v2057_v54  ;;  %v2083_v54 = vld [vmem:[#allocation10 + $0x38] sm:$0xff]  }
  0xca   : > { %1107 = vmatprep.subr.bf16.mxu0 %v2065_v55  ;;  %v2084_v55 = vld [vmem:[#allocation10 + $0xb8] sm:$0xff]  }
  0xcd   : > { %1108 = vmatpush2.bf16.msra.mxu0 %v2063_v56 }
  0xce   : > { %1109 = vmatprep.subr.bf16.mxu0 %v2071_v28 }
  0xd1   : > { %1110 = vmatpush2.bf16.msra.mxu0 %v2069_v30 }
  0xd2   : > { %1111 = vmatprep.subr.bf16.mxu0 %v2077_v32 }
  0xd5   : > { %1112 = vmatpush2.bf16.msra.mxu0 %v2075_v34 }
  0xd6   : > { %1793 = vmatprep.subr.bf16.mxu0 %v2081_v36 }
 0x158   : > { %v514_v58 = vpop.f32.mrf.mxu0 }
 0x159   : > { %v515_v59 = vadd.f32 %v1658_v57, %v514_v58  ;;  %v2085_v57 = vld [vmem:[#allocation10 + $0x70] sm:$0xff]  }
 0x15a   : > { %v1855_v60 = vpop.f32.mrf.mxu0  ;;  %v2086_v58 = vld [vmem:[#allocation10 + $0xf0] sm:$0xff]  }
 0x15b   : > { %v520_v61 = vmax.f32 %v515_v59, 0.0  ;;  %v2087_v59 = vld [vmem:[#allocation10 + $0x30] sm:$0xff]  }
 0x15c   : > { %v517_v62 = vpop.f32.mrf.mxu0  ;;  %v2088_v60 = vld [vmem:[#allocation10 + $0xb0] sm:$0xff]  }
 0x15d   : > { %v521_v0 = vpack.c.bf16 %v520_v61, %v520_v61  ;;  %v2089_v61 = vld [vmem:[#allocation10 + $0x68] sm:$0xff]  }
 0x15e   : > { %v1856_v2 = vpop.f32.mrf.mxu0  ;;  %v2090_v62 = vld [vmem:[#allocation10 + $0xe8] sm:$0xff]  }
 0x15f   : > { %663 = vmatmul.mubr.bf16.vlgmr.msra.gmra.mxu1 %v521_v0  ;;  %v2092_v0 = vld [vmem:[#allocation10 + $0xa8] sm:$0xff]   ;;  %v2094_v2 = vld [vmem:[#allocation10 + $0xe0] sm:$0xff]  }
 0x160   : > { %1123 = vmatpush1.bf16.msra.mxu1 %v1988_v63  ;;  %v2091_v63 = vld [vmem:[#allocation10 + $0x28] sm:$0xff]  }
 0x161   : > { %1124 = vmatprep.subr.bf16.mxu1 %v1996_v1  ;;  %v2093_v1 = vld [vmem:[#allocation10 + $0x60] sm:$0xff]  }
 0x164   : > { %1125 = vmatpush1.bf16.msra.mxu1 %v1994_v3  ;;  %v2095_v3 = vld [vmem:[#allocation10 + $0x20] sm:$0xff]  }
 0x165   : > { %1126 = vmatprep.subr.bf16.mxu1 %v2002_v4  ;;  %v2096_v4 = vld [vmem:[#allocation10 + $0xa0] sm:$0xff]  }
 0x168   : > { %1127 = vmatpush1.bf16.msra.mxu1 %v2000_v5  ;;  %v2097_v5 = vld [vmem:[#allocation10 + $0x58] sm:$0xff]  }
 0x169   : > { %1128 = vmatprep.subr.bf16.mxu1 %v2008_v6  ;;  %v2098_v6 = vld [vmem:[#allocation10 + $0xd8] sm:$0xff]  }
 0x16c   : > { %1129 = vmatpush1.bf16.msra.mxu1 %v2006_v7  ;;  %v2099_v7 = vld [vmem:[#allocation10 + $0x18] sm:$0xff]  }
 0x16d   : > { %1130 = vmatprep.subr.bf16.mxu1 %v2014_v8  ;;  %v2100_v8 = vld [vmem:[#allocation10 + $0x98] sm:$0xff]  }
 0x170   : > { %1131 = vmatpush1.bf16.msra.mxu1 %v2012_v9  ;;  %v2101_v9 = vld [vmem:[#allocation10 + $0x50] sm:$0xff]  }
 0x171   : > { %1132 = vmatprep.subr.bf16.mxu1 %v2020_v10  ;;  %v2102_v10 = vld [vmem:[#allocation10 + $0xd0] sm:$0xff]  }
 0x174   : > { %1133 = vmatpush1.bf16.msra.mxu1 %v2018_v11  ;;  %v2103_v11 = vld [vmem:[#allocation10 + $0x10] sm:$0xff]  }
 0x175   : > { %1134 = vmatprep.subr.bf16.mxu1 %v2026_v12  ;;  %v2104_v12 = vld [vmem:[#allocation10 + $0x90] sm:$0xff]  }
 0x178   : > { %1135 = vmatpush1.bf16.msra.mxu1 %v2024_v13  ;;  %v2105_v13 = vld [vmem:[#allocation10 + $0x48] sm:$0xff]  }
 0x179   : > { %1136 = vmatprep.subr.bf16.mxu1 %v2032_v14  ;;  %v2106_v14 = vld [vmem:[#allocation10 + $0xc8] sm:$0xff]  }
 0x17c   : > { %1137 = vmatpush1.bf16.msra.mxu1 %v2030_v15  ;;  %v2107_v15 = vld [vmem:[#allocation10 + $0x8] sm:$0xff]  }
 0x17d   : > { %1138 = vmatprep.subr.bf16.mxu1 %v2038_v16  ;;  %v2108_v16 = vld [vmem:[#allocation10 + $0x88] sm:$0xff]  }
 0x180   : > { %1139 = vmatpush2.bf16.msra.mxu1 %v2036_v17  ;;  %v2109_v17 = vld [vmem:[#allocation10 + $0x40] sm:$0xff]  }
 0x181   : > { %1140 = vmatprep.subr.bf16.mxu1 %v2044_v18  ;;  %v2110_v18 = vld [vmem:[#allocation10 + $0xc0] sm:$0xff]  }
 0x184   : > { %1141 = vmatpush2.bf16.msra.mxu1 %v2042_v19  ;;  %v2111_v19 = vld [vmem:[#allocation10] sm:$0xff]  }
 0x185   : > { %1142 = vmatprep.subr.bf16.mxu1 %v2050_v20  ;;  %v2112_v20 = vld [vmem:[#allocation10 + $0x80] sm:$0xff]  }
 0x188   : > { %1143 = vmatpush2.bf16.msra.mxu1 %v2048_v21  ;;  %v751_v21 = vsub.s32 2, %v2565_v39 }
 0x189   : > { %1144 = vmatprep.subr.bf16.mxu1 %v2056_v22  ;;  %v739_v22 = vld [vmem:[%s2636_s6] sm:$0xf] }
 0x18c   : > { %1145 = vmatpush2.bf16.msra.mxu1 %v2054_v23  ;;  %v755_v23 = vsub.s32 3, %v2565_v39 }
 0x18d   : > { %1146 = vmatprep.subr.bf16.mxu1 %v2062_v24  ;;  %v744_v24 = vrot.slane %v739_v22, %v542_v40 }
 0x190   : > { %1147 = vmatpush2.bf16.msra.mxu1 %v2060_v25  ;;  %v752_v25 = vrot.slane %v739_v22, %v751_v21 }
 0x191   : > { %1148 = vmatprep.subr.bf16.mxu1 %v2068_v26  ;;  %v748_v26 = vrot.slane %v739_v22, %v546_v42 }
 0x194   : > { %1149 = vmatpush2.bf16.msra.mxu1 %v2066_v27  ;;  %v756_v27 = vrot.slane %v739_v22, %v755_v23 }
 0x195   : > { %1150 = vmatprep.subr.bf16.mxu1 %v2074_v29 }
 0x198   : > { %1151 = vmatpush2.bf16.msra.mxu1 %v2072_v31 }
 0x199   : > { %1152 = vmatprep.subr.bf16.mxu1 %v2080_v33 }
 0x19c   : > { %1153 = vmatpush2.bf16.msra.mxu1 %v2078_v35 }
 0x19d   : > { %1815 = vmatprep.subr.bf16.mxu1 %v2082_v37 }
 0x21f   : > { %v664_v45 = vpop.f32.mrf.mxu1 }
 0x220   : > { %v665_v46 = vadd.f32 %v664_v45, %v543_v43 }
 0x221   : > { %v666_v47 = vpop.f32.mrf.mxu1 }
 0x222   : > { %v667_v48 = vadd.f32 %v666_v47, %v547_v44  ;;  %v671_v49 = vmax.f32 %v665_v46, 0.0 }
 0x223   : > { %v668_v50 = vpop.f32.mrf.mxu1 }
 0x224   : > { %v672_v51 = vmax.f32 %v667_v48, 0.0  ;;  %v673_v56 = vpack.c.bf16 %v671_v49, %v671_v49  ;;  %v1747_v50 = vld [vmem:[%s2638_s8] ss:$0 sm:$0xff] }
 0x225   : > { %v669_v52 = vpop.f32.mrf.mxu1 }
 0x226   : > { %v674_v53 = vpack.c.bf16 %v672_v51, %v672_v51 }
 0x228   : > { %1113 = vmatprep.mubr.bf16.mxu0 %v674_v53  ;;  %1154 = vmatprep.mubr.bf16.mxu1 %v674_v53 }
 0x229   : > { %1114 = vmatmul.mubr.bf16.vlgmr.msra.gmra.mxu0 %v673_v56  ;;  %1155 = vmatmul.mubr.bf16.vlgmr.msra.gmra.mxu1 %v673_v56 }
 0x22a   : > { %1794 = vmatpush3.bf16.msra.mxu0 %v2083_v54  ;;  %1816 = vmatpush3.bf16.msra.mxu1 %v2084_v55 }
 0x22b   : > { %1795 = vmatprep.subr.bf16.mxu0 %v2085_v57  ;;  %1817 = vmatprep.subr.bf16.mxu1 %v2086_v58 }
 0x22e   : > { %1796 = vmatpush3.bf16.msra.mxu0 %v2087_v59  ;;  %1818 = vmatpush3.bf16.msra.mxu1 %v2088_v60 }
 0x22f   : > { %1797 = vmatprep.subr.bf16.mxu0 %v2089_v61  ;;  %1819 = vmatprep.subr.bf16.mxu1 %v2090_v62 }
 0x232   : > { %1798 = vmatpush3.bf16.msra.mxu0 %v2091_v63  ;;  %1820 = vmatpush3.bf16.msra.mxu1 %v2092_v0 }
 0x233   : > { %1799 = vmatprep.subr.bf16.mxu0 %v2093_v1  ;;  %1821 = vmatprep.subr.bf16.mxu1 %v2094_v2 }
 0x236   : > { %1800 = vmatpush3.bf16.msra.mxu0 %v2095_v3  ;;  %1822 = vmatpush3.bf16.msra.mxu1 %v2096_v4 }
 0x237   : > { %1801 = vmatprep.subr.bf16.mxu0 %v2097_v5  ;;  %1823 = vmatprep.subr.bf16.mxu1 %v2098_v6 }
 0x23a   : > { %1802 = vmatpush3.bf16.msra.mxu0 %v2099_v7  ;;  %1824 = vmatpush3.bf16.msra.mxu1 %v2100_v8 }
 0x23b   : > { %1803 = vmatprep.subr.bf16.mxu0 %v2101_v9  ;;  %1825 = vmatprep.subr.bf16.mxu1 %v2102_v10 }
 0x23e   : > { %1804 = vmatpush3.bf16.msra.mxu0 %v2103_v11  ;;  %1826 = vmatpush3.bf16.msra.mxu1 %v2104_v12 }
 0x23f   : > { %1805 = vmatprep.subr.bf16.mxu0 %v2105_v13  ;;  %1827 = vmatprep.subr.bf16.mxu1 %v2106_v14 }
 0x242   : > { %1806 = vmatpush3.bf16.msra.mxu0 %v2107_v15  ;;  %1828 = vmatpush3.bf16.msra.mxu1 %v2108_v16 }
 0x243   : > { %1807 = vmatprep.subr.bf16.mxu0 %v2109_v17  ;;  %1829 = vmatprep.subr.bf16.mxu1 %v2110_v18 }
 0x246   : > { %1808 = vmatpush3.bf16.msra.mxu0 %v2111_v19  ;;  %1830 = vmatpush3.bf16.msra.mxu1 %v2112_v20 }
 0x2e9   : > { %v1115_v28 = vpop.f32.mrf.mxu0  ;;  %v1156_v29 = vpop.f32.mrf.mxu1 }
 0x2ea   : > { %v1116_v30 = vadd.f32 %v1115_v28, %v744_v24  ;;  %v1157_v31 = vadd.f32 %v1156_v29, %v752_v25 }
 0x2eb   : > { %v1117_v32 = vpop.f32.mrf.mxu0  ;;  %v1158_v33 = vpop.f32.mrf.mxu1 }
 0x2ec   : > { %v1118_v34 = vadd.f32 %v1117_v32, %v748_v26  ;;  %v1159_v35 = vadd.f32 %v1158_v33, %v756_v27  ;;  %v1163_v36 = vmax.f32 %v1116_v30, 0.0  ;;  %v1165_v37 = vmax.f32 %v1157_v31, 0.0 }
 0x2ed   : > { %v1119_v38 = vpop.f32.mrf.mxu0  ;;  %v1160_v41 = vpop.f32.mrf.mxu1 }
 0x2ee   : > { %v1164_v43 = vmax.f32 %v1118_v34, 0.0  ;;  %v1166_v44 = vmax.f32 %v1159_v35, 0.0  ;;  %v1167_v42 = vpack.c.bf16 %v1163_v36, %v1163_v36  ;;  %v1169_v47 = vpack.c.bf16 %v1165_v37, %v1165_v37 }
 0x2ef   : > { %v1120_v40 = vpop.f32.mrf.mxu0  ;;  %v1161_v45 = vpop.f32.mrf.mxu1 }
 0x2f0   : > { %v1168_v46 = vpack.c.bf16 %v1164_v43, %v1164_v43  ;;  %v1170_v39 = vpack.c.bf16 %v1166_v44, %v1166_v44 }
 0x2f2   : > { %1466 = vmatprep.mubr.bf16.mxu0 %v1168_v46  ;;  %1506 = vmatprep.mubr.bf16.mxu1 %v1170_v39 }
 0x2f3   : > { %1467 = vmatmul.mubr.bf16.vlgmr.msra.gmra.mxu0 %v1167_v42  ;;  %1507 = vmatmul.mubr.bf16.vlgmr.msra.gmra.mxu1 %v1169_v47 }
 0x3b3   : > { %v1809_v48 = vpop.f32.mrf.mxu0  ;;  %v1831_v49 = vpop.f32.mrf.mxu1 }
 0x3b5   : > { %v1810_v51 = vpop.f32.mrf.mxu0  ;;  %v1832_v52 = vpop.f32.mrf.mxu1 }
 0x3b6   : > { %v1811_v53 = vadd.f32 %v1810_v51, %v1809_v48  ;;  %v1833_v57 = vadd.f32 %v1832_v52, %v1831_v49 }
 0x3b7   : > { %v1812_v54 = vpop.f32.mrf.mxu0  ;;  %v1834_v55 = vpop.f32.mrf.mxu1 }
 0x3b8   : > { %v1469_v56 = vadd.f32 %v1811_v53, %v1747_v50 }
 0x3b9   : > { %v1813_v58 = vpop.f32.mrf.mxu0  ;;  %v1835_v59 = vpop.f32.mrf.mxu1 }
 0x3ba   : > { %v1509_v60 = vadd.f32 %v1833_v57, %v1469_v56 }
 0x3bc   : > { %v1514_v61 = vsub.f32 0.0, %v1509_v60 }
 0x3be   : > { %v1515_v62 = vmul.f32 1.442695, %v1514_v61 }
 0x3c0   : > { %2113 = vpow2.f32 %v1515_v62 }
 0x3cd   : > { %v2114_v63 = vpop.eup %2113 }
 0x3ce   : > { %v1517_v0 = vadd.f32 1.0, %v2114_v63 }
 0x3d0   : > { %2115 = vrcp.f32 %v1517_v0 }
 0x3dd   : > { %v2116_v1 = vpop.eup %2115 }
 0x3de   : > { %1519 = vst [vmem:[%s405_s19] sm:$0xff] %v2116_v1 }
 0x3df   : > { %2262 = shalt.err (!%p2259_p4)
}
 0x3e0   : > { %s2263_s27 = scalar_lea.hbm %s2594_s7, 128  ;;  %s2267_s17 = scalar_lea.hbm %s2639_s9, 512 }
 0x3e1   : > { %p2264_p7 = scmp.ne.s32.totalorder %s2594_s7, %s2263_s27  ;;  %p2268_p5 = scmp.lt.s32.totalorder %s2594_s7, %s2639_s9 }
 0x3e2   : > { %p2269_p12 = scmp.lt.s32.totalorder %s2267_s17, %s2263_s27 }
 0x3e3   : > { %p2265_p1 = pnand %p2264_p7, %p2665_p2 }
 0x3e4   : > { %p2270_p13 = por %p2269_p12, %p2268_p5 }
 0x3e5   : > { %p2266_p3 = pneg %p2265_p1 }
 0x3e7   : > { %p2271_p0 = pnand %p2270_p13, %p2266_p3 }
 0x3e9   : > { %2274 = shalt.err (!%p2271_p0)
}
 0x3ea   : > { %1875 = dma.vmem_to_hbm [thread:$0]  (%p2665_p2), %s1535_s22, 128, %s2594_s7, %s1521_s1  }
 0x3eb PF: > { %p1907_p9 = scmp.ge.s32.totalorder %s2321_s12, 2  ;;  %s1546_s18 = sand.u32 1, %s2309_s30  }
 0x3ec   : > { %p2666_p8 = scmp.ne.s32.totalorder %s2657_s26, 0  ;;  %s1547_s19 = scalar_lea.sflag [#allocation4], %s1546_s18 }
 0x3ee   : > { %p1895_p10 = pnand %p1907_p9, %p2666_p8 }
 0x3f0   : > { %p1896_p11 = pneg %p1895_p10 }
 0x3f2   : > { %2304 = dma.done.wait (%p1896_p11), %s1547_s19, 128  }
 0x3f3   : > { %2306 = vsyncadd (%p1896_p11), %s1547_s19, 4294967168  ;;  %p24_p6 = scmp.ge.s32.totalorder %s2478_s13, 6   ;;  %s2667_s30 = smov %s2313_s10 }
 0x3f4   : > { %s2668_s10 = smov %s2317_s11  ;;  %s2669_s11 = smov %s2489_s20 }
 0x3f5   : > { %s2670_s12 = smov %s2478_s13  ;;  %26 = sbr.rel (!%p24_p6) target bundleno = 12 (0xc), region = 117 }
 0x3fa   :  { %1552 = vsyncpa [#allocation3], 1 }
 0x3fb   :  { %1554 = vsyncpa [#allocation3 + $0x1], 1 }
 0x3fc   :  { %1555 = vsyncpa [#allocation6], 1 }
 0x3fd   :  { %1556 = vsyncpa [#allocation9], 1 }
 0x3fe   :  { %1557 = vsyncpa [#allocation4], 1 }
 0x3ff   :  { %1559 = vsyncpa [#allocation4 + $0x1], 1 }

</bundles_post_ra>
